<compile_context>
chip_gen: v7x
topology: tpu7x:2x2x1
jax: 0.10.0
libtpu: 0.0.40
codegen_flags: <defaults>
</compile_context>

<pallas_src>
import functools

import jax
import jax.numpy as jnp
from jax.experimental import pallas as pl
from jax.experimental.pallas import tpu as pltpu


# --------------------------------------------------------------------------
# Kernel
# --------------------------------------------------------------------------
def _critic_kernel(s_ref, a_ref,
                   w1s_ref, w1a_ref, b1_ref,
                   w2a_ref, b2a_ref, w2b_ref, b2b_ref,
                   w3_ref, b3_ref,
                   out_ref, *, hidden):
    """One batch tile of both critic heads, entirely in VMEM."""
    cw = w1s_ref.dtype  # compute dtype of the MXU operands (f32 or bf16)

    s = s_ref[...].astype(cw)
    a = a_ref[...].astype(cw)

    # Layer 1, both heads fused along the output axis.  Split-weight form of
    # concat([state, action], 1) @ W1 -- avoids any data concat.
    h1 = (jnp.dot(s, w1s_ref[...], preferred_element_type=jnp.float32)
          + jnp.dot(a, w1a_ref[...], preferred_element_type=jnp.float32)
          + b1_ref[...])
    h1 = jnp.maximum(h1, 0.0)                      # [TB, 2*hidden], f32

    h1a = h1[:, :hidden].astype(cw)                # lane-aligned slices
    h1b = h1[:, hidden:].astype(cw)

    # Layer 2 (different inputs per head -> two matmuls).
    h2a = jnp.maximum(
        jnp.dot(h1a, w2a_ref[...], preferred_element_type=jnp.float32)
        + b2a_ref[...], 0.0)
    h2b = jnp.maximum(
        jnp.dot(h1b, w2b_ref[...], preferred_element_type=jnp.float32)
        + b2b_ref[...], 0.0)

    # Layer 3: both 1-wide projections fused into one [2*hidden, 2] matmul
    # (block-structured weights), producing a single [TB, 2] output stream.
    h2 = jnp.concatenate([h2a, h2b], axis=1).astype(cw)   # [TB, 2*hidden]
    q = jnp.dot(h2, w3_ref[...], preferred_element_type=jnp.float32) + b3_ref[...]

    out_ref[...] = q.astype(out_ref.dtype)


# --------------------------------------------------------------------------
# Wrapper
# --------------------------------------------------------------------------
def critic_forward(state, action, packed, *, block_b=1024):
    """Returns (q1, q2), each [B, 1], matching the PyTorch module."""
    state = state.astype(jnp.float32)
    action = action.astype(jnp.float32)

    B, S = state.shape
    A = action.shape[1]
    hidden = packed["hidden"]  # padded hidden width (multiple of 128)

    # Batch tiling: single full-array block for small batches, otherwise
    # block_b-row tiles (pad batch so the grid divides evenly).
    if B <= block_b:
        tb = B
        padded_b = B
    else:
        tb = block_b
        padded_b = ((B + tb - 1) // tb) * tb
        if padded_b != B:
            state = jnp.pad(state, ((0, padded_b - B), (0, 0)))
            action = jnp.pad(action, ((0, padded_b - B), (0, 0)))
    grid = (padded_b // tb,)

    def batched(i):
        return (i, 0)

    def resident(i):
        return (0, 0)

    weight_args = (
        packed["w1s"], packed["w1a"], packed["b1"],
        packed["w2a"], packed["b2a"], packed["w2b"], packed["b2b"],
        packed["w3"], packed["b3"],
    )
    weight_specs = [pl.BlockSpec(w.shape, resident) for w in weight_args]

    kernel = functools.partial(_critic_kernel, hidden=hidden)

    out = pl.pallas_call(
        kernel,
        out_shape=jax.ShapeDtypeStruct((padded_b, 2), jnp.float32),
        grid_spec=pltpu.PrefetchScalarGridSpec(
            num_scalar_prefetch=0,
            grid=grid,
            in_specs=[
                pl.BlockSpec((tb, S), batched),
                pl.BlockSpec((tb, A), batched),
            ] + weight_specs,
            out_specs=pl.BlockSpec((tb, 2), batched),
        ),
        compiler_params=pltpu.CompilerParams(
            dimension_semantics=("parallel",)),
    )(state, action, *weight_args)

    out = out[:B]
    return out[:, 0:1], out[:, 1:2]


# --------------------------------------------------------------------------
# Parameters
# --------------------------------------------------------------------------
def init_critic_params(key, state_dim, action_dim, net_width):
    """PyTorch-style default Linear init: U(-1/sqrt(fan_in), 1/sqrt(fan_in))."""
    in_dim = state_dim + action_dim
    dims = [(in_dim, net_width), (net_width, net_width), (net_width, 1)]
    params = {}
    keys = jax.random.split(key, 12)
    k = 0
    for head in ("q1", "q2"):
        for li, (fan_in, fan_out) in enumerate(dims, start=1):
            bound = 1.0 / (fan_in ** 0.5)
            params[f"{head}_w{li}"] = jax.random.uniform(
                keys[k], (fan_in, fan_out), minval=-bound, maxval=bound,
                dtype=jnp.float32)
            k += 1
            params[f"{head}_b{li}"] = jax.random.uniform(
                keys[k], (1, fan_out), minval=-bound, maxval=bound,
                dtype=jnp.float32)
            k += 1
    return params


def pack_critic_params(params, state_dim, action_dim, *,
                       weight_dtype=jnp.float32, lane=128):
    """Build the fused / lane-padded weight layout consumed by the kernel.

    weight_dtype=jnp.bfloat16 halves weight DMA bytes (f32 accumulation is
    kept inside the kernel); default float32 for bit-faithful results.
    """
    W = params["q1_w1"].shape[1]
    Wp = max(lane, ((W + lane - 1) // lane) * lane)  # padded hidden width

    def pad(x, rows, cols):
        out = jnp.zeros((rows, cols), jnp.float32)
        return out.at[:x.shape[0], :x.shape[1]].set(x)

    in_dim = state_dim + action_dim
    # Layer 1: both heads fused along the output axis, then split by input
    # rows into a state part and an action part (removes the input concat).
    w1 = jnp.concatenate([pad(params["q1_w1"], in_dim, Wp),
                          pad(params["q2_w1"], in_dim, Wp)], axis=1)
    b1 = jnp.concatenate([pad(params["q1_b1"], 1, Wp),
                          pad(params["q2_b1"], 1, Wp)], axis=1)
    # Layer 3: block-structured [2*Wp, 2] so one matmul yields [B, 2].
    w3 = jnp.zeros((2 * Wp, 2), jnp.float32)
    w3 = w3.at[:W, 0].set(params["q1_w3"][:, 0])
    w3 = w3.at[Wp:Wp + W, 1].set(params["q2_w3"][:, 0])
    b3 = jnp.concatenate([params["q1_b3"], params["q2_b3"]], axis=1)

    packed = {
        "hidden": int(Wp),
        "w1s": w1[:state_dim].astype(weight_dtype),
        "w1a": w1[state_dim:].astype(weight_dtype),
        "b1": b1,  # biases stay f32 (added on the f32 accumulator)
        "w2a": pad(params["q1_w2"], Wp, Wp).astype(weight_dtype),
        "b2a": pad(params["q1_b2"], 1, Wp),
        "w2b": pad(params["q2_w2"], Wp, Wp).astype(weight_dtype),
        "b2b": pad(params["q2_b2"], 1, Wp),
        "w3": w3.astype(weight_dtype),
        "b3": b3,
    }
    return packed


# --------------------------------------------------------------------------
# Pure-JAX reference (unfused, matches PyTorch semantics exactly)
# --------------------------------------------------------------------------
def _reference_forward(state, action, params):
    x = jnp.concatenate([state, action], axis=1).astype(jnp.float32)

    def mlp(h, head):
        h = jnp.maximum(h @ params[f"{head}_w1"] + params[f"{head}_b1"], 0.0)
        h = jnp.maximum(h @ params[f"{head}_w2"] + params[f"{head}_b2"], 0.0)
        return h @ params[f"{head}_w3"] + params[f"{head}_b3"]

    return mlp(x, "q1"), mlp(x, "q2")


# --------------------------------------------------------------------------
# Test
# --------------------------------------------------------------------------
if __name__ == "__main__":
    batch, state_dim, action_dim, net_width = 2, 8, 4, 32

    key = jax.random.PRNGKey(0)
    k_state, k_action, k_params = jax.random.split(key, 3)

    state = jax.random.normal(k_state, (batch, state_dim), dtype=jnp.float32)
    action = jax.random.normal(k_action, (batch, action_dim), dtype=jnp.float32)

    params = init_critic_params(k_params, state_dim, action_dim, net_width)
    packed = pack_critic_params(params, state_dim, action_dim,
                                weight_dtype=jnp.float32)

    q1, q2 = critic_forward(state, action, packed)
    jax.block_until_ready((q1, q2))

    q1_ref, q2_ref = _reference_forward(state, action, params)
    assert q1.shape == (batch, 1) and q2.shape == (batch, 1)
    assert jnp.allclose(q1, q1_ref, atol=1e-4, rtol=1e-4), "q1 mismatch"
    assert jnp.allclose(q2, q2_ref, atol=1e-4, rtol=1e-4), "q2 mismatch"

    print("KERNEL_OK")
</pallas_src>

<mosaic_0001>
module attributes {stable_mosaic.version = 11 : i64} {
  func.func @_critic_kernel(%arg0: i32, %arg1: memref<2x8xf32, #tpu.memory_space<vmem>>, %arg2: memref<2x4xf32, #tpu.memory_space<vmem>>, %arg3: memref<8x256xf32, #tpu.memory_space<vmem>>, %arg4: memref<4x256xf32, #tpu.memory_space<vmem>>, %arg5: memref<1x256xf32, #tpu.memory_space<vmem>>, %arg6: memref<128x128xf32, #tpu.memory_space<vmem>>, %arg7: memref<1x128xf32, #tpu.memory_space<vmem>>, %arg8: memref<128x128xf32, #tpu.memory_space<vmem>>, %arg9: memref<1x128xf32, #tpu.memory_space<vmem>>, %arg10: memref<256x2xf32, #tpu.memory_space<vmem>>, %arg11: memref<1x2xf32, #tpu.memory_space<vmem>>, %arg12: memref<2x2xf32, #tpu.memory_space<vmem>>) attributes {dimension_semantics = [#tpu.dimension_semantics<parallel>], iteration_bounds = array<i64: 1>, scalar_prefetch = 0 : i64, scratch_operands = 0 : i64, tpu.core_type = #tpu.core_type<tc>, window_params = [{transform_indices = @transform_0, window_bounds = array<i64: 2, 8>}, {transform_indices = @transform_1, window_bounds = array<i64: 2, 4>}, {pipeline_mode = #tpu.pipeline_mode<synchronous>, transform_indices = @transform_2, window_bounds = array<i64: 8, 256>}, {pipeline_mode = #tpu.pipeline_mode<synchronous>, transform_indices = @transform_3, window_bounds = array<i64: 4, 256>}, {pipeline_mode = #tpu.pipeline_mode<synchronous>, transform_indices = @transform_4, window_bounds = array<i64: 1, 256>}, {pipeline_mode = #tpu.pipeline_mode<synchronous>, transform_indices = @transform_5, window_bounds = array<i64: 128, 128>}, {pipeline_mode = #tpu.pipeline_mode<synchronous>, transform_indices = @transform_6, window_bounds = array<i64: 1, 128>}, {pipeline_mode = #tpu.pipeline_mode<synchronous>, transform_indices = @transform_7, window_bounds = array<i64: 128, 128>}, {pipeline_mode = #tpu.pipeline_mode<synchronous>, transform_indices = @transform_8, window_bounds = array<i64: 1, 128>}, {pipeline_mode = #tpu.pipeline_mode<synchronous>, transform_indices = @transform_9, window_bounds = array<i64: 256, 2>}, {pipeline_mode = #tpu.pipeline_mode<synchronous>, transform_indices = @transform_10, window_bounds = array<i64: 1, 2>}, {transform_indices = @transform_11, window_bounds = array<i64: 2, 2>}]} {
    %c0 = arith.constant 0 : index
    %c0_0 = arith.constant 0 : index
    %0 = vector.load %arg1[%c0, %c0_0] : memref<2x8xf32, #tpu.memory_space<vmem>>, vector<2x8xf32>
    %c0_1 = arith.constant 0 : index
    %c0_2 = arith.constant 0 : index
    %1 = vector.load %arg2[%c0_1, %c0_2] : memref<2x4xf32, #tpu.memory_space<vmem>>, vector<2x4xf32>
    %c0_3 = arith.constant 0 : index
    %c0_4 = arith.constant 0 : index
    %2 = vector.load %arg3[%c0_3, %c0_4] : memref<8x256xf32, #tpu.memory_space<vmem>>, vector<8x256xf32>
    %cst = arith.constant dense<0.000000e+00> : vector<2x256xf32>
    %3 = tpu.matmul %0, %2, %cst {dimension_numbers = #tpu.dot_dimension_numbers<[1], [0], [0], [1], [0, 0, 1, 1], [], []>} : vector<2x8xf32>, vector<8x256xf32>, vector<2x256xf32> -> vector<2x256xf32>
    %c0_5 = arith.constant 0 : index
    %c0_6 = arith.constant 0 : index
    %4 = vector.load %arg4[%c0_5, %c0_6] : memref<4x256xf32, #tpu.memory_space<vmem>>, vector<4x256xf32>
    %cst_7 = arith.constant dense<0.000000e+00> : vector<2x256xf32>
    %5 = tpu.matmul %1, %4, %cst_7 {dimension_numbers = #tpu.dot_dimension_numbers<[1], [0], [0], [1], [0, 0, 1, 1], [], []>} : vector<2x4xf32>, vector<4x256xf32>, vector<2x256xf32> -> vector<2x256xf32>
    %6 = arith.addf %3, %5 : vector<2x256xf32>
    %c0_8 = arith.constant 0 : index
    %c0_9 = arith.constant 0 : index
    %7 = vector.load %arg5[%c0_8, %c0_9] : memref<1x256xf32, #tpu.memory_space<vmem>>, vector<1x256xf32>
    %8 = vector.broadcast %7 : vector<1x256xf32> to vector<2x256xf32>
    %9 = arith.addf %6, %8 : vector<2x256xf32>
    %cst_10 = arith.constant 0.000000e+00 : f32
    %10 = vector.broadcast %cst_10 : f32 to vector<2x256xf32>
    %11 = arith.maximumf %9, %10 : vector<2x256xf32>
    %12 = vector.extract_strided_slice %11 {offsets = [0, 0], sizes = [2, 128], strides = [1, 1]} : vector<2x256xf32> to vector<2x128xf32>
    %13 = vector.extract_strided_slice %11 {offsets = [0, 128], sizes = [2, 128], strides = [1, 1]} : vector<2x256xf32> to vector<2x128xf32>
    %c0_11 = arith.constant 0 : index
    %c0_12 = arith.constant 0 : index
    %14 = vector.load %arg6[%c0_11, %c0_12] : memref<128x128xf32, #tpu.memory_space<vmem>>, vector<128x128xf32>
    %cst_13 = arith.constant dense<0.000000e+00> : vector<2x128xf32>
    %15 = tpu.matmul %12, %14, %cst_13 {dimension_numbers = #tpu.dot_dimension_numbers<[1], [0], [0], [1], [0, 0, 1, 1], [], []>} : vector<2x128xf32>, vector<128x128xf32>, vector<2x128xf32> -> vector<2x128xf32>
    %c0_14 = arith.constant 0 : index
    %c0_15 = arith.constant 0 : index
    %16 = vector.load %arg7[%c0_14, %c0_15] : memref<1x128xf32, #tpu.memory_space<vmem>>, vector<1x128xf32>
    %17 = vector.broadcast %16 : vector<1x128xf32> to vector<2x128xf32>
    %18 = arith.addf %15, %17 : vector<2x128xf32>
    %cst_16 = arith.constant 0.000000e+00 : f32
    %19 = vector.broadcast %cst_16 : f32 to vector<2x128xf32>
    %20 = arith.maximumf %18, %19 : vector<2x128xf32>
    %c0_17 = arith.constant 0 : index
    %c0_18 = arith.constant 0 : index
    %21 = vector.load %arg8[%c0_17, %c0_18] : memref<128x128xf32, #tpu.memory_space<vmem>>, vector<128x128xf32>
    %cst_19 = arith.constant dense<0.000000e+00> : vector<2x128xf32>
    %22 = tpu.matmul %13, %21, %cst_19 {dimension_numbers = #tpu.dot_dimension_numbers<[1], [0], [0], [1], [0, 0, 1, 1], [], []>} : vector<2x128xf32>, vector<128x128xf32>, vector<2x128xf32> -> vector<2x128xf32>
    %c0_20 = arith.constant 0 : index
    %c0_21 = arith.constant 0 : index
    %23 = vector.load %arg9[%c0_20, %c0_21] : memref<1x128xf32, #tpu.memory_space<vmem>>, vector<1x128xf32>
    %24 = vector.broadcast %23 : vector<1x128xf32> to vector<2x128xf32>
    %25 = arith.addf %22, %24 : vector<2x128xf32>
    %cst_22 = arith.constant 0.000000e+00 : f32
    %26 = vector.broadcast %cst_22 : f32 to vector<2x128xf32>
    %27 = arith.maximumf %25, %26 : vector<2x128xf32>
    %28 = tpu.concatenate %20, %27 in 1 : vector<2x128xf32>, vector<2x128xf32> -> vector<2x256xf32>
    %c0_23 = arith.constant 0 : index
    %c0_24 = arith.constant 0 : index
    %29 = vector.load %arg10[%c0_23, %c0_24] : memref<256x2xf32, #tpu.memory_space<vmem>>, vector<256x2xf32>
    %cst_25 = arith.constant dense<0.000000e+00> : vector<2x2xf32>
    %30 = tpu.matmul %28, %29, %cst_25 {dimension_numbers = #tpu.dot_dimension_numbers<[1], [0], [0], [1], [0, 0, 1, 1], [], []>} : vector<2x256xf32>, vector<256x2xf32>, vector<2x2xf32> -> vector<2x2xf32>
    %c0_26 = arith.constant 0 : index
    %c0_27 = arith.constant 0 : index
    %31 = vector.load %arg11[%c0_26, %c0_27] : memref<1x2xf32, #tpu.memory_space<vmem>>, vector<1x2xf32>
    %32 = vector.broadcast %31 : vector<1x2xf32> to vector<2x2xf32>
    %33 = arith.addf %30, %32 : vector<2x2xf32>
    %c0_28 = arith.constant 0 : index
    %c0_29 = arith.constant 0 : index
    %34 = vector.load %arg12[%c0_28, %c0_29] : memref<2x2xf32, #tpu.memory_space<vmem>>, vector<2x2xf32>
    tpu.vector_store %arg12[%c0_28, %c0_29], %33 {strides = array<i32>} : memref<2x2xf32, #tpu.memory_space<vmem>>, vector<2x2xf32>,
    return
  }
  func.func @transform_0(%arg0: i32) -> (i32, i32) {
    %c0_i32 = arith.constant 0 : i32
    %c0_i32_0 = arith.constant 0 : i32
    return %arg0, %c0_i32 : i32, i32
  }
  func.func @transform_1(%arg0: i32) -> (i32, i32) {
    %c0_i32 = arith.constant 0 : i32
    %c0_i32_0 = arith.constant 0 : i32
    return %arg0, %c0_i32 : i32, i32
  }
  func.func @transform_2(%arg0: i32) -> (i32, i32) {
    %c0_i32 = arith.constant 0 : i32
    %c0_i32_0 = arith.constant 0 : i32
    %c0_i32_1 = arith.constant 0 : i32
    return %c0_i32, %c0_i32_0 : i32, i32
  }
  func.func @transform_3(%arg0: i32) -> (i32, i32) {
    %c0_i32 = arith.constant 0 : i32
    %c0_i32_0 = arith.constant 0 : i32
    %c0_i32_1 = arith.constant 0 : i32
    return %c0_i32, %c0_i32_0 : i32, i32
  }
  func.func @transform_4(%arg0: i32) -> (i32, i32) {
    %c0_i32 = arith.constant 0 : i32
    %c0_i32_0 = arith.constant 0 : i32
    %c0_i32_1 = arith.constant 0 : i32
    return %c0_i32, %c0_i32_0 : i32, i32
  }
  func.func @transform_5(%arg0: i32) -> (i32, i32) {
    %c0_i32 = arith.constant 0 : i32
    %c0_i32_0 = arith.constant 0 : i32
    %c0_i32_1 = arith.constant 0 : i32
    return %c0_i32, %c0_i32_0 : i32, i32
  }
  func.func @transform_6(%arg0: i32) -> (i32, i32) {
    %c0_i32 = arith.constant 0 : i32
    %c0_i32_0 = arith.constant 0 : i32
    %c0_i32_1 = arith.constant 0 : i32
    return %c0_i32, %c0_i32_0 : i32, i32
  }
  func.func @transform_7(%arg0: i32) -> (i32, i32) {
    %c0_i32 = arith.constant 0 : i32
    %c0_i32_0 = arith.constant 0 : i32
    %c0_i32_1 = arith.constant 0 : i32
    return %c0_i32, %c0_i32_0 : i32, i32
  }
  func.func @transform_8(%arg0: i32) -> (i32, i32) {
    %c0_i32 = arith.constant 0 : i32
    %c0_i32_0 = arith.constant 0 : i32
    %c0_i32_1 = arith.constant 0 : i32
    return %c0_i32, %c0_i32_0 : i32, i32
  }
  func.func @transform_9(%arg0: i32) -> (i32, i32) {
    %c0_i32 = arith.constant 0 : i32
    %c0_i32_0 = arith.constant 0 : i32
    %c0_i32_1 = arith.constant 0 : i32
    return %c0_i32, %c0_i32_0 : i32, i32
  }
  func.func @transform_10(%arg0: i32) -> (i32, i32) {
    %c0_i32 = arith.constant 0 : i32
    %c0_i32_0 = arith.constant 0 : i32
    %c0_i32_1 = arith.constant 0 : i32
    return %c0_i32, %c0_i32_0 : i32, i32
  }
  func.func @transform_11(%arg0: i32) -> (i32, i32) {
    %c0_i32 = arith.constant 0 : i32
    %c0_i32_0 = arith.constant 0 : i32
    return %arg0, %c0_i32 : i32, i32
  }
}

</mosaic_0001>

<bundles_post_ra>
// kernel: tpu_custom_call.1
= control target key start
LH: loop header
LB: loop body
LE: loop exit
PB: predicated region body
PF: predicated region fallthrough
CT: control target
= control target key end

     0   :  { %16 = vsyncpa [#allocation3], 0  ;;  %s1195_s0 = inlined_call_operand.vmem [shape: f32[2,8], index: 0, kind: input, shape index: {}]   ;;  %s1196_s1 = inlined_call_operand.hbm [shape: f32[2,4], index: 1, kind: input, shape index: {}]   ;;  %s1197_s2 = inlined_call_operand.hbm [shape: f32[8,256], index: 2, kind: input, shape index: {}]   ;;  %s1198_s3 = inlined_call_operand.vmem [shape: f32[4,256], index: 3, kind: input, shape index: {}]   ;;  %s1199_s4 = inlined_call_operand.vmem [shape: f32[1,256], index: 4, kind: input, shape index: {}]   ;;  %s1200_s5 = inlined_call_operand.vmem [shape: f32[128,128], index: 5, kind: input, shape index: {}]   ;;  %s1201_s6 = inlined_call_operand.vmem [shape: f32[1,128], index: 6, kind: input, shape index: {}]   ;;  %s1202_s7 = inlined_call_operand.vmem [shape: f32[128,128], index: 7, kind: input, shape index: {}]   ;;  %s1203_s8 = inlined_call_operand.vmem [shape: f32[1,128], index: 8, kind: input, shape index: {}]   ;;  %s1204_s9 = inlined_call_operand.vmem [shape: f32[256,2], index: 9, kind: input, shape index: {}]   ;;  %s1205_s10 = inlined_call_operand.vmem [shape: f32[1,2], index: 10, kind: input, shape index: {}]   ;;  %s1206_s11 = inlined_call_operand.hbm [shape: f32[2,2], index: 11, kind: output, shape index: {}]  }
   0x1   :  { %17 = vsyncpa [#allocation6], 0 }
   0x2   :  { %18 = vsyncpa [#allocation4], 0  ;;  %s863_s17 = smov [#allocation2]   ;;  %s864_s19 = smov [#allocation5]  }
   0x3   :  { %s27_s18 = sshll.u32 %s863_s17, 4  ;;  %s37_s20 = sshll.u32 %s864_s19, 4  ;;  %s28_s18 = int_to_ptr.vmem [resolvable:$true] %s27_s18  ;;  %s38_s20 = int_to_ptr.vmem [resolvable:$true] %s37_s20 }
   0x4   :  { %s791_s23 = scalar_lea.hbm %s1196_s1, 32 }
   0x5   :  { %p792_p0 = scmp.ne.s32.totalorder %s1196_s1, %s791_s23  ;;  %p795_p1 = scmp.lt.u32.totalorder %s791_s23, %s1196_s1 }
   0x7   :  { %p797_p2 = pnand %p795_p1, %p792_p0 }
   0x9   :  { %800 = shalt.err (!%p797_p2)
}
   0xa   :  { %s801_s28 = scalar_lea.vmem %s28_s18, 32  ;;  %p806_p4 = scmp.lt.s32.totalorder %s28_s18, %s28_s18 }
   0xb   :  { %p802_p3 = scmp.ne.s32.totalorder %s28_s18, %s801_s28  ;;  %p807_p5 = scmp.lt.s32.totalorder %s801_s28, %s801_s28 }
   0xd   :  { %p808_p6 = por %p807_p5, %p806_p4 }
   0xf   :  { %p809_p7 = pnand %p808_p6, %p802_p3 }
  0x11   :  { %812 = shalt.err (!%p809_p7)
}
  0x12   :  { %30 = dma.hbm_to_vmem [thread:$0]  %s1196_s1, 32, %s28_s18, [#allocation3]  }
  0x13   :  { %s813_s14 = scalar_lea.hbm %s1197_s2, 256 }
  0x14   :  { %p814_p8 = scmp.ne.s32.totalorder %s1197_s2, %s813_s14  ;;  %p817_p9 = scmp.lt.u32.totalorder %s813_s14, %s1197_s2 }
  0x16   :  { %p819_p10 = pnand %p817_p9, %p814_p8 }
  0x18   :  { %822 = shalt.err (!%p819_p10)
}
  0x19   :  { %s823_s21 = scalar_lea.vmem %s38_s20, 256  ;;  %p828_p12 = scmp.lt.s32.totalorder %s38_s20, %s38_s20 }
  0x1a   :  { %p824_p11 = scmp.ne.s32.totalorder %s38_s20, %s823_s21  ;;  %p829_p13 = scmp.lt.s32.totalorder %s823_s21, %s823_s21 }
  0x1c   :  { %p830_p0 = por %p829_p13, %p828_p12 }
  0x1e   :  { %p831_p1 = pnand %p830_p0, %p824_p11 }
  0x20   :  { %834 = shalt.err (!%p831_p1)
}
  0x21   :  { %40 = dma.hbm_to_vmem [thread:$0]  %s1197_s2, 256, %s38_s20, [#allocation6]  }
  0x22   :  { %857 = dma.done.wait [#allocation3], 32  }
  0x23   :  { %858 = vsyncadd [#allocation3], 4294967264 }
  0x24   :  { %859 = dma.done.wait [#allocation6], 256  }
  0x25   :  { %860 = vsyncadd [#allocation6], 4294967040  ;;  %v865_v0 = vmov 0.0   ;;  %v866_v1 = vmov 0.0|0.0   ;;  %v67_v2 = vld [vmem:[%s1198_s3] sm:$0xff]  ;;  %vm74_vm0 = vcmask 1043456   ;;  %v227_v59 = vlaneseq }
  0x26   :  { %143 = vmatprep.mubr.f32.mxu0 %v865_v0  ;;  %702 = vmatprep.subr.bf16.mxu1 %v866_v1  ;;  %v69_v3 = vcombine.high %v67_v2, %v67_v2  ;;  %v241_v4 = vld [vmem:[%s1200_s5] sm:$0xff]  ;;  %vm70_vm1 = vcmask 31744   ;;  %v66_v6 = vld [vmem:[#allocation5 + $0x8] sm:$0xff]  ;;  %v244_v11 = vld [vmem:[%s1200_s5 + $0x18] sm:$0xff]  ;;  %vm150_vm2 = vcmask 64512   ;;  %vm867_vm3 = vmmov 0  }
  0x27   :  { %v64_v5 = vld [vmem:[#allocation2] sm:$0x3]  ;;  %v242_v7 = vld [vmem:[%s1200_s5 + $0x8] sm:$0xff]  ;;  %v243_v10 = vld [vmem:[%s1200_s5 + $0x10] sm:$0xff]  ;;  %664 = vmatprep.mubr.msk.f32.mxu1 %vm867_vm3, %v865_v0  ;;  %v228_v60 = vshrl.u32 %v227_v59, 7  ;;  %vm538_vm4 = vcmask 9216  }
  0x28   :  { %556 = vmatprep.subr.msk.mxu0 %vm74_vm0, %v69_v3  ;;  %v65_v8 = vld [vmem:[#allocation5] sm:$0xff]  ;;  %v703_v9 = vpack.c.bf16 %v242_v7, %v241_v4  ;;  %v706_v14 = vpack.c.bf16 %v244_v11, %v243_v10  ;;  %v63_v17 = vld [vmem:[%s1195_s0] sm:$0x3]  ;;  %v337_v19 = vld [vmem:[%s1202_s7 + $0x10] sm:$0xff] }
  0x29   :  { %557 = vmatpush1.msk.msra.mxu0 %vm74_vm0, %v67_v2  ;;  %v335_v12 = vld [vmem:[%s1202_s7] sm:$0xff]  ;;  %v336_v13 = vld [vmem:[%s1202_s7 + $0x8] sm:$0xff]  ;;  %v338_v20 = vld [vmem:[%s1202_s7 + $0x18] sm:$0xff]  ;;  %v229_v61 = vsub.s32 0, %v228_v60  ;;  %v233_v63 = vsub.s32 1, %v228_v60 }
  0x2a   :  { %558 = vmatmul.mubr.msk.f32.vlgmr.msra.gmra.mrb[0].mxu0 %vm70_vm1, %v64_v5  ;;  %154 = vmatprep.subr.mxu0 %v66_v6  ;;  %v245_v15 = vld [vmem:[%s1200_s5 + $0x20] sm:$0xff]  ;;  %v246_v16 = vld [vmem:[%s1200_s5 + $0x28] sm:$0xff]  ;;  %v727_v18 = vpack.c.bf16 %v336_v13, %v335_v12  ;;  %v247_v22 = vld [vmem:[%s1200_s5 + $0x30] sm:$0xff]  ;;  %v730_v24 = vpack.c.bf16 %v338_v20, %v337_v19 }
  0x2b   :  { %155 = vmatpush1.msra.mxu0 %v65_v8  ;;  %218 = vmatprep.mubr.f32.mxu0 %v865_v0  ;;  %v709_v21 = vpack.c.bf16 %v246_v16, %v245_v15  ;;  %v248_v23 = vld [vmem:[%s1200_s5 + $0x38] sm:$0xff]  ;;  %v339_v25 = vld [vmem:[%s1202_s7 + $0x20] sm:$0xff]  ;;  %v340_v26 = vld [vmem:[%s1202_s7 + $0x28] sm:$0xff] }
  0x2c   :  { %704 = vmatpush3.bf16.msra.mxu1 %v703_v9  ;;  %726 = vmatprep.subr.bf16.mxu0 %v866_v1  ;;  %v712_v27 = vpack.c.bf16 %v248_v23, %v247_v22  ;;  %v249_v28 = vld [vmem:[%s1200_s5 + $0x40] sm:$0xff]  ;;  %v250_v29 = vld [vmem:[%s1200_s5 + $0x48] sm:$0xff]  ;;  %v733_v30 = vpack.c.bf16 %v340_v26, %v339_v25  ;;  %v341_v31 = vld [vmem:[%s1202_s7 + $0x30] sm:$0xff] }
  0x2d   :  { %705 = vmatprep.subr.bf16.mxu1 %v866_v1  ;;  %v342_v32 = vld [vmem:[%s1202_s7 + $0x38] sm:$0xff]  ;;  %v715_v33 = vpack.c.bf16 %v250_v29, %v249_v28  ;;  %v251_v34 = vld [vmem:[%s1200_s5 + $0x50] sm:$0xff]  ;;  %v343_v37 = vld [vmem:[%s1202_s7 + $0x40] sm:$0xff] }
  0x2e   :  { %v252_v35 = vld [vmem:[%s1200_s5 + $0x58] sm:$0xff]  ;;  %v736_v36 = vpack.c.bf16 %v342_v32, %v341_v31  ;;  %v344_v38 = vld [vmem:[%s1202_s7 + $0x48] sm:$0xff]  ;;  %v253_v40 = vld [vmem:[%s1200_s5 + $0x60] sm:$0xff] }
  0x2f   :  { %v718_v39 = vpack.c.bf16 %v252_v35, %v251_v34  ;;  %v254_v41 = vld [vmem:[%s1200_s5 + $0x68] sm:$0xff]  ;;  %v739_v42 = vpack.c.bf16 %v344_v38, %v343_v37  ;;  %v345_v43 = vld [vmem:[%s1202_s7 + $0x50] sm:$0xff]  ;;  %v346_v44 = vld [vmem:[%s1202_s7 + $0x58] sm:$0xff] }
  0x30   :  { %707 = vmatpush3.bf16.msra.mxu1 %v706_v14  ;;  %v721_v45 = vpack.c.bf16 %v254_v41, %v253_v40  ;;  %v742_v46 = vpack.c.bf16 %v346_v44, %v345_v43  ;;  %v347_v47 = vld [vmem:[%s1202_s7 + $0x60] sm:$0xff]  ;;  %v348_v48 = vld [vmem:[%s1202_s7 + $0x68] sm:$0xff]  ;;  %v255_v50 = vld [vmem:[%s1200_s5 + $0x70] sm:$0xff] }
  0x31   :  { %708 = vmatprep.subr.bf16.mxu1 %v866_v1  ;;  %v745_v49 = vpack.c.bf16 %v348_v48, %v347_v47  ;;  %v256_v51 = vld [vmem:[%s1200_s5 + $0x78] sm:$0xff]  ;;  %v349_v53 = vld [vmem:[%s1202_s7 + $0x70] sm:$0xff]  ;;  %v445_v56 = vld [vmem:[%s1204_s9 + $0x80] sm:$0xff] }
  0x32   :  { %559 = vmatmul.mubr.msk.f32.vlgmr.msra.gmra.mrb[0].mxu0 %vm150_vm2, %v63_v17  ;;  %v724_v52 = vpack.c.bf16 %v256_v51, %v255_v50  ;;  %v350_v54 = vld [vmem:[%s1202_s7 + $0x78] sm:$0xff]  ;;  %v446_v57 = vld [vmem:[%s1204_s9 + $0x88] sm:$0xff]  ;;  %v225_v62 = vld [vmem:[%s1199_s4] sm:$0x3] }
  0x33   :  { %728 = vmatpush3.bf16.msra.mxu0 %v727_v18  ;;  %v748_v55 = vpack.c.bf16 %v350_v54, %v349_v53  ;;  %699 = vmatprep.mubr.msk.f32.mxu0 %vm867_vm3, %v865_v0  ;;  %v750_v58 = vpack.c.bf16 %v446_v57, %v445_v56  ;;  %v234_v0 = vrot.slane %v225_v62, %v233_v63  ;;  %v429_v2 = vld [vmem:[%s1204_s9] sm:$0xff]  ;;  %v430_v3 = vld [vmem:[%s1204_s9 + $0x8] sm:$0xff]  ;;  %v447_v5 = vld [vmem:[%s1204_s9 + $0x90] sm:$0xff] }
  0x34   :  { %729 = vmatprep.subr.bf16.mxu0 %v866_v1  ;;  %710 = vmatpush3.bf16.msra.mxu1 %v709_v21  ;;  %v448_v6 = vld [vmem:[%s1204_s9 + $0x98] sm:$0xff]  ;;  %v752_v10 = vpack.c.bf16 %v430_v3, %v429_v2  ;;  %v431_v13 = vld [vmem:[%s1204_s9 + $0x10] sm:$0xff]  ;;  %v449_v16 = vld [vmem:[%s1204_s9 + $0xa0] sm:$0xff] }
  0x35   :  { %711 = vmatprep.subr.bf16.mxu1 %v866_v1  ;;  %v754_v12 = vpack.c.bf16 %v448_v6, %v447_v5  ;;  %v432_v14 = vld [vmem:[%s1204_s9 + $0x18] sm:$0xff]  ;;  %v450_v17 = vld [vmem:[%s1204_s9 + $0xa8] sm:$0xff]  ;;  %v433_v20 = vld [vmem:[%s1204_s9 + $0x20] sm:$0xff] }
  0x36   :  { %v756_v18 = vpack.c.bf16 %v432_v14, %v431_v13  ;;  %v758_v19 = vpack.c.bf16 %v450_v17, %v449_v16  ;;  %v434_v21 = vld [vmem:[%s1204_s9 + $0x28] sm:$0xff]  ;;  %v451_v22 = vld [vmem:[%s1204_s9 + $0xb0] sm:$0xff]  ;;  %v452_v23 = vld [vmem:[%s1204_s9 + $0xb8] sm:$0xff] }
  0x37   :  { %731 = vmatpush3.bf16.msra.mxu0 %v730_v24  ;;  %v760_v24 = vpack.c.bf16 %v434_v21, %v433_v20  ;;  %v762_v25 = vpack.c.bf16 %v452_v23, %v451_v22  ;;  %v435_v26 = vld [vmem:[%s1204_s9 + $0x30] sm:$0xff]  ;;  %v453_v28 = vld [vmem:[%s1204_s9 + $0xc0] sm:$0xff]  ;;  %v454_v29 = vld [vmem:[%s1204_s9 + $0xc8] sm:$0xff] }
  0x38   :  { %732 = vmatprep.subr.bf16.mxu0 %v866_v1  ;;  %713 = vmatpush3.bf16.msra.mxu1 %v712_v27  ;;  %v436_v27 = vld [vmem:[%s1204_s9 + $0x38] sm:$0xff]  ;;  %v766_v31 = vpack.c.bf16 %v454_v29, %v453_v28  ;;  %v437_v32 = vld [vmem:[%s1204_s9 + $0x40] sm:$0xff]  ;;  %v455_v34 = vld [vmem:[%s1204_s9 + $0xd0] sm:$0xff] }
  0x39   :  { %714 = vmatprep.subr.bf16.mxu1 %v866_v1  ;;  %v456_v35 = vld [vmem:[%s1204_s9 + $0xd8] sm:$0xff]  ;;  %v439_v38 = vld [vmem:[%s1204_s9 + $0x50] sm:$0xff]  ;;  %v457_v40 = vld [vmem:[%s1204_s9 + $0xe0] sm:$0xff] }
  0x3a   :  { %v770_v37 = vpack.c.bf16 %v456_v35, %v455_v34  ;;  %v458_v41 = vld [vmem:[%s1204_s9 + $0xe8] sm:$0xff]  ;;  %v441_v44 = vld [vmem:[%s1204_s9 + $0x60] sm:$0xff]  ;;  %v459_v47 = vld [vmem:[%s1204_s9 + $0xf0] sm:$0xff] }
  0x3b   :  { %734 = vmatpush3.bf16.msra.mxu0 %v733_v30  ;;  %v764_v30 = vpack.c.bf16 %v436_v27, %v435_v26  ;;  %v774_v43 = vpack.c.bf16 %v458_v41, %v457_v40  ;;  %v460_v48 = vld [vmem:[%s1204_s9 + $0xf8] sm:$0xff]  ;;  %v443_v50 = vld [vmem:[%s1204_s9 + $0x70] sm:$0xff]  ;;  %v560_v53 = vld [vmem:[%s1201_s6] ss:$0 sm:$0xff]  ;;  %s868_s6 = smov [#allocation7]  }
  0x3c   :  { %735 = vmatprep.subr.bf16.mxu0 %v866_v1  ;;  %716 = vmatpush3.bf16.msra.mxu1 %v715_v33  ;;  %v438_v33 = vld [vmem:[%s1204_s9 + $0x48] sm:$0xff]  ;;  %v444_v51 = vld [vmem:[%s1204_s9 + $0x78] sm:$0xff]  ;;  %v561_v54 = vld [vmem:[%s1203_s8] ss:$0 sm:$0xff]  ;;  %s546_s15 = sshll.u32 %s868_s6, 4  ;;  %s547_s15 = int_to_ptr.vmem [resolvable:$true] %s546_s15 }
  0x3d   :  { %717 = vmatprep.subr.bf16.mxu1 %v866_v1  ;;  %s835_s8 = scalar_lea.vmem %s547_s15, 32  ;;  %p840_p3 = scmp.lt.s32.totalorder %s547_s15, %s547_s15 }
  0x3e   :  { %p836_p2 = scmp.ne.s32.totalorder %s547_s15, %s835_s8  ;;  %p841_p4 = scmp.lt.s32.totalorder %s835_s8, %s835_s8 }
  0x3f   :  { %737 = vmatpush3.bf16.msra.mxu0 %v736_v36  ;;  %v768_v36 = vpack.c.bf16 %v438_v33, %v437_v32 }
  0x40   :  { %738 = vmatprep.subr.bf16.mxu0 %v866_v1  ;;  %719 = vmatpush3.bf16.msra.mxu1 %v718_v39  ;;  %v440_v39 = vld [vmem:[%s1204_s9 + $0x58] sm:$0xff]  ;;  %p842_p5 = por %p841_p4, %p840_p3 }
  0x41   :  { %720 = vmatprep.subr.bf16.mxu1 %v866_v1 }
  0x42   :  { %p843_p6 = pnand %p842_p5, %p836_p2 }
  0x43   :  { %740 = vmatpush3.bf16.msra.mxu0 %v739_v42  ;;  %v772_v42 = vpack.c.bf16 %v440_v39, %v439_v38 }
  0x44   :  { %741 = vmatprep.subr.bf16.mxu0 %v866_v1  ;;  %722 = vmatpush3.bf16.msra.mxu1 %v721_v45  ;;  %v442_v45 = vld [vmem:[%s1204_s9 + $0x68] sm:$0xff] }
  0x45   :  { %723 = vmatprep.subr.bf16.mxu1 %v866_v1 }
  0x47   :  { %743 = vmatpush3.bf16.msra.mxu0 %v742_v46  ;;  %v776_v46 = vpack.c.bf16 %v442_v45, %v441_v44 }
  0x48   :  { %744 = vmatprep.subr.bf16.mxu0 %v866_v1  ;;  %725 = vmatpush3.bf16.msra.mxu1 %v724_v52  ;;  %v780_v52 = vpack.c.bf16 %v444_v51, %v443_v50 }
  0x49   :  { %751 = vmatprep.subr.bf16.mxu1 %v750_v58 }
  0x4b   :  { %746 = vmatpush3.bf16.msra.mxu0 %v745_v49  ;;  %v778_v49 = vpack.c.bf16 %v460_v48, %v459_v47 }
  0x4c   :  { %747 = vmatprep.subr.bf16.mxu0 %v866_v1  ;;  %v230_v1 = vrot.slane %v225_v62, %v229_v61 }
  0x4f   :  { %749 = vmatpush3.bf16.msra.mxu0 %v748_v55 }
 0x105   :  { %v220_v4 = vpop.f32.mrb[0].mxu0 }
 0x106   :  { %v237_v7 = vadd.f32 %v230_v1, %v220_v4  ;;  %v222_v8 = vpop.f32.mrb[1].mxu0  ;;  %v562_v1 = vld [vmem:[%s1205_s10] ss:$0 sm:$0xff] }
 0x107   :  { %v238_v9 = vadd.f32 %v234_v0, %v222_v8 }
 0x108   :  { %v239_v11 = vmax.f32 %v237_v7, 0.0 }
 0x109   :  { %v240_v15 = vmax.f32 %v238_v9, 0.0 }
 0x10a   :  { %665 = vmatmul.mubr.f32.vlgmr.msra.gmra.mrb[0].mxu1 %v239_v11 }
 0x10b   :  { %700 = vmatmul.mubr.f32.vlgmr.msra.gmra.mrb[2].mxu0 %v240_v15  ;;  %753 = vmatpush3.bf16.msra.mxu1 %v752_v10 }
 0x10c   :  { %755 = vmatprep.subr.bf16.mxu1 %v754_v12 }
 0x10f   :  { %757 = vmatpush3.bf16.msra.mxu1 %v756_v18 }
 0x110   :  { %759 = vmatprep.subr.bf16.mxu1 %v758_v19 }
 0x113   :  { %761 = vmatpush3.bf16.msra.mxu1 %v760_v24 }
 0x114   :  { %763 = vmatprep.subr.bf16.mxu1 %v762_v25 }
 0x117   :  { %765 = vmatpush3.bf16.msra.mxu1 %v764_v30 }
 0x118   :  { %767 = vmatprep.subr.bf16.mxu1 %v766_v31 }
 0x11b   :  { %769 = vmatpush3.bf16.msra.mxu1 %v768_v36 }
 0x11c   :  { %771 = vmatprep.subr.bf16.mxu1 %v770_v37 }
 0x11f   :  { %773 = vmatpush3.bf16.msra.mxu1 %v772_v42 }
 0x120   :  { %775 = vmatprep.subr.bf16.mxu1 %v774_v43 }
 0x123   :  { %777 = vmatpush3.bf16.msra.mxu1 %v776_v46 }
 0x124   :  { %779 = vmatprep.subr.bf16.mxu1 %v778_v49 }
 0x127   :  { %781 = vmatpush3.bf16.msra.mxu1 %v780_v52 }
 0x1dd   :  { %v330_v55 = vpop.f32.mrb[0].mxu1 }
 0x1de   :  { %v331_v56 = vadd.f32 %v560_v53, %v330_v55  ;;  %v666_v57 = vpop.f32.mrb[1].mxu1  ;;  %v424_v58 = vpop.f32.mrb[2].mxu0 }
 0x1df   :  { %v425_v59 = vadd.f32 %v561_v54, %v424_v58  ;;  %v701_v60 = vpop.f32.mrb[3].mxu0 }
 0x1e0   :  { %v334_v62 = vmax.f32 %v331_v56, 0.0 }
 0x1e1   :  { %v428_v61 = vmax.f32 %v425_v59, 0.0 }
 0x1e3   :  { %532 = vmatprep.mubr.f32.mxu1 %v428_v61 }
 0x1e4   :  { %533 = vmatmul.mubr.f32.vlgmr.msra.gmra.mrb[2].mxu1 %v334_v62 }
 0x2b7   :  { %v629_v63 = vpop.f32.mrb[2].mxu1 }
 0x2b8   :  { %v630_v0 = vpop.f32.mrb[3].mxu1 }
 0x2b9   :  { %v631_v2 = vadd.f32 %v630_v0, %v629_v63 }
 0x2bb   :  { %v535_v3 = vadd.f32 %v631_v2, %v562_v1 }
 0x2bd   :  { %539 = vst.msk [vmem:[#allocation7] sm:$0x3] %vm538_vm4, %v535_v3 }
 0x2be   :  { %846 = shalt.err (!%p843_p6)
}
 0x2bf   :  { %s847_s19 = scalar_lea.hbm %s1206_s11, 32 }
 0x2c0   :  { %p848_p7 = scmp.ne.s32.totalorder %s1206_s11, %s847_s19  ;;  %p851_p8 = scmp.lt.u32.totalorder %s847_s19, %s1206_s11 }
 0x2c2   :  { %p853_p9 = pnand %p851_p8, %p848_p7 }
 0x2c4   :  { %856 = shalt.err (!%p853_p9)
}
 0x2c5   :  { %549 = dma.vmem_to_hbm [thread:$0]  %s547_s15, 32, %s1206_s11, [#allocation4]  }
 0x2c6   :  { %861 = dma.done.wait [#allocation4], 32  }
 0x2c7   :  { %862 = vsyncadd [#allocation4], 4294967264 }
 0x2c8   :  { %553 = vsyncpa [#allocation3], 1 }
 0x2c9   :  { %554 = vsyncpa [#allocation6], 1 }
 0x2ca   :  { %555 = vsyncpa [#allocation4], 1 }

</bundles_post_ra>
